<compile_context>
chip_gen: v7x
topology: tpu7x:2x2x1
jax: 0.10.0
libtpu: 0.0.40
codegen_flags: <defaults>
</compile_context>

<pallas_src>
import math

import jax
import jax.numpy as jnp
from jax.experimental import pallas as pl
from jax.experimental.pallas import tpu as pltpu


def make_pe_buffer(d_model: int, max_len: int = 10000, dtype=jnp.float32) -> jnp.ndarray:
    """Positional-encoding buffer, identical to the PyTorch __init__.

    Build it once in the activation dtype so the forward pass never needs a
    per-call cast/slice of the buffer.
    """
    if d_model % 2 != 0:
        # The PyTorch original also fails (shape mismatch) for odd d_model.
        raise ValueError("d_model must be even for this positional encoding.")
    position = jnp.arange(0, max_len, dtype=jnp.float32)[:, None]            # (max_len, 1)
    div_term = jnp.exp(
        jnp.arange(0, d_model, 2, dtype=jnp.float32) * (-math.log(10000.0) / d_model)
    )                                                                         # (d_model//2,)
    angles = position * div_term                                              # (max_len, d_model//2)
    pe = jnp.zeros((max_len, d_model), dtype=jnp.float32)
    pe = pe.at[:, 0::2].set(jnp.sin(angles))
    pe = pe.at[:, 1::2].set(jnp.cos(angles))
    return pe[None, :, :].astype(dtype)                                       # (1, max_len, d_model)


def _pe_add_kernel(x_ref, pe_ref, o_ref):
    # Elementwise add; pe broadcasts over the sublane/batch axis when needed.
    o_ref[...] = x_ref[...] + pe_ref[...]


def _target_block_bytes() -> int:
    """Generation-aware per-block byte budget.

    v6e/v7x have a 32 MiB scoped-VMEM default -> ~4 MiB blocks (5-6 live
    buffers stay <= 24 MiB).  v5e (16 MiB scoped default) and unknown chips
    stay at 2 MiB, which compiles everywhere.
    """
    kind = ""
    try:
        kind = jax.devices()[0].device_kind.lower()
    except Exception:
        pass
    if ("v6" in kind) or ("v7" in kind):
        return 4 * 1024 * 1024
    return 2 * 1024 * 1024


def positional_encoding_forward(x: jnp.ndarray, pe: jnp.ndarray) -> jnp.ndarray:
    """x: (B, S, D); pe: (1, max_len, D). Returns x + pe[:, :S, :] (eval-mode dropout)."""
    B, S, D = x.shape
    if pe.ndim != 3 or pe.shape[0] != 1 or pe.shape[2] != D:
        raise ValueError(f"pe buffer shape {pe.shape} incompatible with x shape {x.shape}")
    max_len = pe.shape[1]
    if S > max_len:
        raise ValueError(f"seq_len={S} exceeds max_len={max_len} of the pe buffer")

    itemsize = jnp.dtype(x.dtype).itemsize
    sublane = (8 * 4) // itemsize            # 8 rows for f32, 16 for bf16
    budget = _target_block_bytes()

    cost = pl.CostEstimate(
        flops=B * S * D,
        transcendentals=0,
        bytes_accessed=(2 * B * S * D + S * D) * itemsize,
    )

    if D % 128 == 0:
        # ---------------- lane-dense 3-D path ----------------
        rows_budget = max(sublane, budget // (D * itemsize))
        ts = min(S, (rows_budget // sublane) * sublane)
        if ts <= 0 or ts >= S:
            ts = S                           # full-extent block is always legal
            # Megacore: with B == 1 a (1, 1) grid leaves one v7x TensorCore
            # idle; split S into >= 2 sublane-aligned tiles instead.
            if B == 1 and S > sublane:
                half = -(-((S + 1) // 2) // sublane) * sublane
                if half < S:
                    ts = half
        grid = (pl.cdiv(S, ts), B)           # B is the inner axis -> pe tile reused

        if pe.dtype != x.dtype or (ts % sublane != 0):
            # Rare path: pe was not pre-built in x.dtype, or ts must equal the
            # pe block's full extent -> slice/cast only the rows actually used.
            pe_in = pe[:, :S, :].astype(x.dtype)
        else:
            pe_in = pe                       # window the full buffer, no HBM slice copy

        def run(pe_single_buffered: bool):
            pe_kwargs = {"pipeline_mode": pl.Buffered(1)} if pe_single_buffered else {}
            return pl.pallas_call(
                _pe_add_kernel,
                out_shape=jax.ShapeDtypeStruct((B, S, D), x.dtype),
                grid_spec=pltpu.PrefetchScalarGridSpec(
                    num_scalar_prefetch=0,
                    grid=grid,
                    in_specs=[
                        pl.BlockSpec((pl.Squeezed(), ts, D), lambda s, b: (b, s, 0)),  # x
                        pl.BlockSpec((pl.Squeezed(), ts, D), lambda s, b: (0, s, 0),   # pe
                                     **pe_kwargs),
                    ],
                    out_specs=pl.BlockSpec((pl.Squeezed(), ts, D), lambda s, b: (b, s, 0)),
                ),
                compiler_params=pltpu.CompilerParams(
                    dimension_semantics=("parallel", "parallel"),
                ),
                cost_estimate=cost,
            )(x, pe_in)

        try:
            # pe's block index is constant across the inner B axis, so its
            # second pipeline buffer is dead VMEM -> single-buffer it.
            return run(pe_single_buffered=True)
        except Exception:
            # Graceful fallback if this jax build rejects Buffered(1).
            return run(pe_single_buffered=False)

    # ------------- lane-dense flattened path (D not a multiple of 128) -------------
    # Flatten (S, D) -> N so output stores are full-lane vst, and tile BOTH the
    # flattened axis (multiples of 128) and the batch axis (sublane multiples)
    # so VMEM use is independent of B.
    N = S * D
    x2 = x.reshape(B, N)
    pe2 = pe[:, :S, :].astype(x.dtype).reshape(1, N)

    tc = min(N, max(128, ((budget // (sublane * itemsize)) // 128) * 128))
    if tc <= 0 or tc >= N:
        tc = N                               # full-extent block is always legal
    rows_budget = max(sublane, budget // (tc * itemsize))
    tb = min(B, (rows_budget // sublane) * sublane)
    if tb <= 0 or tb >= B:
        tb = B
    grid = (pl.cdiv(N, tc), pl.cdiv(B, tb))  # B inner -> pe block reused across batch tiles

    out2 = pl.pallas_call(
        _pe_add_kernel,
        out_shape=jax.ShapeDtypeStruct((B, N), x.dtype),
        grid_spec=pltpu.PrefetchScalarGridSpec(
            num_scalar_prefetch=0,
            grid=grid,
            in_specs=[
                pl.BlockSpec((tb, tc), lambda c, b: (b, c)),   # x
                pl.BlockSpec((1, tc), lambda c, b: (0, c)),    # pe (broadcast over batch)
            ],
            out_specs=pl.BlockSpec((tb, tc), lambda c, b: (b, c)),
        ),
        compiler_params=pltpu.CompilerParams(
            dimension_semantics=("parallel", "parallel"),
        ),
        cost_estimate=cost,
    )(x2, pe2)
    return out2.reshape(B, S, D)


if __name__ == "__main__":
    key = jax.random.PRNGKey(0)
    k1, k2, k3 = jax.random.split(key, 3)

    # Case 1: small d_model (D=32 < 128) -> flattened lane-dense fallback path.
    B, S, D = 2, 8, 32
    x = jax.random.normal(k1, (B, S, D), dtype=jnp.float32)
    pe = make_pe_buffer(d_model=D, max_len=10000, dtype=x.dtype)
    out = jax.block_until_ready(positional_encoding_forward(x, pe))
    ref = x + pe[:, :S, :]
    assert out.shape == (B, S, D)
    assert jnp.allclose(out, ref, atol=1e-6), "mismatch vs reference (flattened path)"

    # Case 2: d_model multiple of 128 -> tiled 3-D path (exercises the S/B grid).
    B2, S2, D2 = 2, 16, 128
    x_b = jax.random.normal(k2, (B2, S2, D2), dtype=jnp.float32)
    pe_b = make_pe_buffer(d_model=D2, max_len=10000, dtype=x_b.dtype)
    out_b = jax.block_until_ready(positional_encoding_forward(x_b, pe_b))
    ref_b = x_b + pe_b[:, :S2, :]
    assert out_b.shape == (B2, S2, D2)
    assert jnp.allclose(out_b, ref_b, atol=1e-6), "mismatch vs reference (3-D path)"

    # Case 3: B == 1 -> sequence gets split into >= 2 tiles (megacore path).
    B3, S3, D3 = 1, 32, 128
    x_c = jax.random.normal(k3, (B3, S3, D3), dtype=jnp.float32)
    out_c = jax.block_until_ready(positional_encoding_forward(x_c, pe_b))
    ref_c = x_c + pe_b[:, :S3, :]
    assert out_c.shape == (B3, S3, D3)
    assert jnp.allclose(out_c, ref_c, atol=1e-6), "mismatch vs reference (B==1 split path)"

    print("KERNEL_OK")
</pallas_src>

<mosaic_0001>
module attributes {stable_mosaic.version = 11 : i64} {
  func.func @_pe_add_kernel(%arg0: i32, %arg1: i32, %arg2: memref<2x256xf32, #tpu.memory_space<vmem>>, %arg3: memref<1x256xf32, #tpu.memory_space<vmem>>, %arg4: memref<2x256xf32, #tpu.memory_space<vmem>>) attributes {dimension_semantics = [#tpu.dimension_semantics<parallel>, #tpu.dimension_semantics<parallel>], iteration_bounds = array<i64: 1, 1>, scalar_prefetch = 0 : i64, scratch_operands = 0 : i64, tpu.core_type = #tpu.core_type<tc>, window_params = [{transform_indices = @transform_0, window_bounds = array<i64: 2, 256>}, {transform_indices = @transform_1, window_bounds = array<i64: 1, 256>}, {transform_indices = @transform_2, window_bounds = array<i64: 2, 256>}]} {
    %c0 = arith.constant 0 : index
    %c0_0 = arith.constant 0 : index
    %0 = vector.load %arg2[%c0, %c0_0] : memref<2x256xf32, #tpu.memory_space<vmem>>, vector<2x256xf32>
    %c0_1 = arith.constant 0 : index
    %c0_2 = arith.constant 0 : index
    %1 = vector.load %arg3[%c0_1, %c0_2] : memref<1x256xf32, #tpu.memory_space<vmem>>, vector<1x256xf32>
    %2 = vector.broadcast %1 : vector<1x256xf32> to vector<2x256xf32>
    %3 = arith.addf %0, %2 : vector<2x256xf32>
    %c0_3 = arith.constant 0 : index
    %c0_4 = arith.constant 0 : index
    %4 = vector.load %arg4[%c0_3, %c0_4] : memref<2x256xf32, #tpu.memory_space<vmem>>, vector<2x256xf32>
    tpu.vector_store %arg4[%c0_3, %c0_4], %3 {strides = array<i32>} : memref<2x256xf32, #tpu.memory_space<vmem>>, vector<2x256xf32>,
    return
  }
  func.func @transform_0(%arg0: i32, %arg1: i32) -> (i32, i32) {
    %c0_i32 = arith.constant 0 : i32
    return %arg1, %arg0 : i32, i32
  }
  func.func @transform_1(%arg0: i32, %arg1: i32) -> (i32, i32) {
    %c0_i32 = arith.constant 0 : i32
    %c0_i32_0 = arith.constant 0 : i32
    return %c0_i32, %arg0 : i32, i32
  }
  func.func @transform_2(%arg0: i32, %arg1: i32) -> (i32, i32) {
    %c0_i32 = arith.constant 0 : i32
    return %arg1, %arg0 : i32, i32
  }
}

</mosaic_0001>

<bundles_post_ra>
// kernel: tpu_custom_call.1
= control target key start
LH: loop header
LB: loop body
LE: loop exit
PB: predicated region body
PF: predicated region fallthrough
CT: control target
= control target key end

     0   :  { %7 = vsyncpa [#allocation3], 0  ;;  %s157_s0 = inlined_call_operand.hbm [shape: f32[2,256], index: 0, kind: input, shape index: {}]   ;;  %s158_s1 = inlined_call_operand.vmem [shape: f32[1,256], index: 1, kind: input, shape index: {}]   ;;  %s159_s2 = inlined_call_operand.hbm [shape: f32[2,256], index: 2, kind: output, shape index: {}]  }
   0x1   :  { %8 = vsyncpa [#allocation4], 0  ;;  %s112_s9 = smov [#allocation2]   ;;  %s64_s13 = scalar_lea.hbm %s157_s0, 64 }
   0x2   :  { %s15_s10 = sshll.u32 %s112_s9, 4  ;;  %p65_p0 = scmp.ne.s32.totalorder %s157_s0, %s64_s13  ;;  %s16_s10 = int_to_ptr.vmem [resolvable:$true] %s15_s10 }
   0x3   :  { %p68_p1 = scmp.lt.u32.totalorder %s64_s13, %s157_s0 }
   0x5   :  { %p70_p2 = pnand %p68_p1, %p65_p0 }
   0x7   :  { %73 = shalt.err (!%p70_p2)
}
   0x8   :  { %s74_s18 = scalar_lea.vmem %s16_s10, 64  ;;  %p79_p4 = scmp.lt.s32.totalorder %s16_s10, %s16_s10 }
   0x9   :  { %p75_p3 = scmp.ne.s32.totalorder %s16_s10, %s74_s18  ;;  %p80_p5 = scmp.lt.s32.totalorder %s74_s18, %s74_s18 }
   0xb   :  { %p81_p6 = por %p80_p5, %p79_p4 }
   0xd   :  { %p82_p7 = pnand %p81_p6, %p75_p3 }
   0xf   :  { %85 = shalt.err (!%p82_p7)
}
  0x10   :  { %18 = dma.hbm_to_vmem [thread:$0]  %s157_s0, 64, %s16_s10, [#allocation3]  }
  0x11   :  { %108 = dma.done.wait [#allocation3], 64  }
  0x12   :  { %109 = vsyncadd [#allocation3], 4294967232  ;;  %v27_v0 = vlaneseq  ;;  %v113_v1 = vmov 1983009808   ;;  %v25_v7 = vld [vmem:[%s158_s1] sm:$0x3] }
  0x13   :  { %v37_v2 = vunpack.c.l.s4 %v113_v1  ;;  %v24_v12 = vld [vmem:[#allocation2] sm:$0xf]  ;;  %s114_s23 = smov [#allocation5]  }
  0x14   :  { %v28_v3 = vshrl.u32 %v27_v0, 7  ;;  %s52_s0 = sshll.u32 %s114_s23, 4  ;;  %s53_s0 = int_to_ptr.vmem [resolvable:$true] %s52_s0 }
  0x15   :  { %v38_v6 = vunpack.c.0.s8 %v37_v2  ;;  %s86_s24 = scalar_lea.vmem %s53_s0, 64  ;;  %p91_p9 = scmp.lt.s32.totalorder %s53_s0, %s53_s0 }
  0x16   :  { %v29_v4 = vsub.s32 0, %v28_v3  ;;  %v33_v5 = vsub.s32 1, %v28_v3  ;;  %p87_p8 = scmp.ne.s32.totalorder %s53_s0, %s86_s24  ;;  %p92_p10 = scmp.lt.s32.totalorder %s86_s24, %s86_s24 }
  0x17   :  { %v41_v10 = vsub.s32 %v38_v6, %v28_v3 }
  0x18   :  { %v30_v8 = vrot.slane %v25_v7, %v29_v4  ;;  %v34_v9 = vrot.slane %v25_v7, %v33_v5  ;;  %p93_p11 = por %p92_p10, %p91_p9 }
  0x1a   :  { %v35_v11 = vcombine.low %v30_v8, %v34_v9  ;;  %p94_p12 = pnand %p93_p11, %p87_p8 }
  0x1c   :  { %v42_v13 = vrot.slane %v35_v11, %v41_v10 }
  0x1e   :  { %v44_v14 = vadd.f32 %v42_v13, %v24_v12 }
  0x20   :  { %45 = vst [vmem:[#allocation5] sm:$0xf] %v44_v14 }
  0x21   :  { %97 = shalt.err (!%p94_p12)
}
  0x22   :  { %s98_s26 = scalar_lea.hbm %s159_s2, 64 }
  0x23   :  { %p99_p13 = scmp.ne.s32.totalorder %s159_s2, %s98_s26  ;;  %p102_p0 = scmp.lt.u32.totalorder %s98_s26, %s159_s2 }
  0x25   :  { %p104_p1 = pnand %p102_p0, %p99_p13 }
  0x27   :  { %107 = shalt.err (!%p104_p1)
}
  0x28   :  { %55 = dma.vmem_to_hbm [thread:$0]  %s53_s0, 64, %s159_s2, [#allocation4]  }
  0x29   :  { %110 = dma.done.wait [#allocation4], 64  }
  0x2a   :  { %111 = vsyncadd [#allocation4], 4294967232 }
  0x2b   :  { %59 = vsyncpa [#allocation3], 1 }
  0x2c   :  { %60 = vsyncpa [#allocation4], 1 }

</bundles_post_ra>
